<compile_context>
chip_gen: v7x
topology: tpu7x:2x2x1
jax: 0.10.0
libtpu: 0.0.40
codegen_flags: <defaults>
</compile_context>

<pallas_src>
import functools

import jax
import jax.numpy as jnp
from jax.experimental import pallas as pl
from jax.experimental.pallas import tpu as pltpu


def _round_up(x, m):
    return ((x + m - 1) // m) * m


def _fcdp_kernel(x_ref, w0_ref, b0_ref, w1_ref, b1_ref, w2_ref, b2_ref,
                 half_ref, mid_ref, out_ref, *, act_dim):
    # Layer 0: (tb, D_in) bf16 @ (D_in, H0_p) bf16 -> f32 acc, + b0, ReLU.
    h = jnp.dot(x_ref[...], w0_ref[...],
                preferred_element_type=jnp.float32) + b0_ref[...]
    h = jnp.maximum(h, 0.0)

    # Layer 1: hidden_layers[0] + ReLU.
    h = jnp.dot(h.astype(jnp.bfloat16), w1_ref[...],
                preferred_element_type=jnp.float32) + b1_ref[...]
    h = jnp.maximum(h, 0.0)

    # Layer 2 (output): padded-N matmul on the MXU, then slice to the real
    # action dim so tanh / rescale / HBM writeback only touch `act_dim` lanes.
    y = jnp.dot(h.astype(jnp.bfloat16), w2_ref[...],
                preferred_element_type=jnp.float32)
    y = y[:, :act_dim] + b2_ref[...]
    # Fused rescale: tanh in [-1, 1] -> [env_min, env_max] via one FMA.
    out_ref[...] = jnp.tanh(y) * half_ref[...] + mid_ref[...]


def prepare_fcdp_params(params, env_min, env_max):
    """One-time packing of FCDP parameters for the Pallas kernel.

    Pads hidden/output weight dims to 128 lanes, casts matmul operands to
    bf16, and folds the tanh->action rescale into (half_range, mid).
    """
    w0, b0, w1, b1, w2, b2 = params
    d_in, h0 = w0.shape
    h1 = w1.shape[1]
    a = w2.shape[1]

    lane = 128
    h0_p = _round_up(h0, lane)
    h1_p = _round_up(h1, lane)
    a_p = _round_up(a, lane)

    def pad2(arr, rows, cols):
        arr = arr.reshape(-1, arr.shape[-1]) if arr.ndim == 2 else arr.reshape(1, -1)
        return jnp.pad(arr, ((0, rows - arr.shape[0]), (0, cols - arr.shape[1])))

    w0_p = pad2(w0, d_in, h0_p).astype(jnp.bfloat16)   # contraction dim left at D_in
    w1_p = pad2(w1, h0_p, h1_p).astype(jnp.bfloat16)
    w2_p = pad2(w2, h1_p, a_p).astype(jnp.bfloat16)    # N padded for MXU; sliced in-kernel
    b0_p = pad2(b0, 1, h0_p).astype(jnp.float32)
    b1_p = pad2(b1, 1, h1_p).astype(jnp.float32)
    b2_p = b2.reshape(1, -1).astype(jnp.float32)       # narrow (1, A), added post-slice

    # nn_min = tanh(-inf) = -1, nn_max = +1  =>  out = tanh*half + mid.
    half = ((env_max - env_min) * 0.5).reshape(1, -1).astype(jnp.float32)
    mid = ((env_max + env_min) * 0.5).reshape(1, -1).astype(jnp.float32)
    return (w0_p, b0_p, w1_p, b1_p, w2_p, b2_p, half, mid)


def fcdp_forward(x, prepared, *, tile_b=2048):
    """x: (B, input_dim) float32. Returns (B, action_dim) float32."""
    w0_p, b0_p, w1_p, b1_p, w2_p, b2_p, half, mid = prepared
    batch, d_in = x.shape
    h0_p = w0_p.shape[1]
    h1_p = w1_p.shape[1]
    a_p = w2_p.shape[1]
    a = b2_p.shape[1]

    sub = 8
    b_p = _round_up(batch, sub)
    tb = min(tile_b, b_p)
    b_p = _round_up(b_p, tb)
    grid = (b_p // tb,)
    # NOTE(v7x): for large B choose tile_b so the grid length is an even
    # number >= 2, letting dimension_semantics=("parallel",) use both TCs.

    # Only B is padded (to a sublane multiple); the feature dim stays D_in and
    # x is shipped as bf16 -> this is the only HBM traffic that scales with B.
    x_p = jnp.pad(x, ((0, b_p - batch), (0, 0))).astype(jnp.bfloat16)

    const2 = lambda i: (0, 0)  # weights/biases/rescale resident across the B loop

    kernel = functools.partial(_fcdp_kernel, act_dim=a)

    out_p = pl.pallas_call(
        kernel,
        out_shape=jax.ShapeDtypeStruct((b_p, a), jnp.float32),
        grid=grid,
        in_specs=[
            pl.BlockSpec((tb, d_in), lambda i: (i, 0)),   # x tile (unpadded features)
            pl.BlockSpec((d_in, h0_p), const2),           # w0
            pl.BlockSpec((1, h0_p), const2),              # b0
            pl.BlockSpec((h0_p, h1_p), const2),           # w1
            pl.BlockSpec((1, h1_p), const2),              # b1
            pl.BlockSpec((h1_p, a_p), const2),            # w2 (N padded to 128)
            pl.BlockSpec((1, a), const2),                 # b2 (narrow)
            pl.BlockSpec((1, a), const2),                 # half_range
            pl.BlockSpec((1, a), const2),                 # mid
        ],
        out_specs=pl.BlockSpec((tb, a), lambda i: (i, 0)),  # unpadded action dim
        compiler_params=pltpu.CompilerParams(
            dimension_semantics=("parallel",),
            vmem_limit_bytes=32 * 1024 * 1024),
    )(x_p, w0_p, b0_p, w1_p, b1_p, w2_p, b2_p, half, mid)

    return out_p[:batch]


def init_linear(key, fan_in, fan_out):
    """PyTorch nn.Linear default init: U(-1/sqrt(fan_in), 1/sqrt(fan_in))."""
    kw, kb = jax.random.split(key)
    bound = 1.0 / (fan_in ** 0.5)
    w = jax.random.uniform(kw, (fan_in, fan_out), jnp.float32, -bound, bound)
    b = jax.random.uniform(kb, (1, fan_out), jnp.float32, -bound, bound)
    return w, b


if __name__ == "__main__":
    key = jax.random.PRNGKey(0)
    k_x, k0, k1, k2 = jax.random.split(key, 4)

    # Small shapes consistent with the module: hidden_dims=(32, 32).
    batch = 2
    input_dim = 16
    hidden_dims = (32, 32)
    action_dim = 2

    # action_bounds: env_min / env_max per action dimension.
    env_min = jnp.array([[-2.0, -1.0]], dtype=jnp.float32)   # (1, action_dim)
    env_max = jnp.array([[2.0, 1.0]], dtype=jnp.float32)     # (1, action_dim)

    # Deterministic synthetic parameters (no checkpoint load).
    w0, b0 = init_linear(k0, input_dim, hidden_dims[0])
    w1, b1 = init_linear(k1, hidden_dims[0], hidden_dims[1])
    w2, b2 = init_linear(k2, hidden_dims[1], action_dim)
    params = (w0, b0, w1, b1, w2, b2)

    # One-time parameter packing (hoisted out of the per-call forward path).
    prepared = prepare_fcdp_params(params, env_min, env_max)

    x = jax.random.normal(k_x, (batch, input_dim), dtype=jnp.float32)

    out = fcdp_forward(x, prepared)
    out = jax.block_until_ready(out)

    # Pure-JAX f32 reference of the same forward semantics.
    h = jnp.maximum(x @ w0 + b0, 0.0)
    h = jnp.maximum(h @ w1 + b1, 0.0)
    t = jnp.tanh(h @ w2 + b2)
    ref = (t - (-1.0)) * (env_max - env_min) / (1.0 - (-1.0)) + env_min

    # bf16 MXU operands => looser tolerance than pure-f32 (outputs are O(1)).
    # (Keep f32 matmuls instead if bit-closer PyTorch parity is ever required;
    #  the kernel is not MXU-bound so the cost would be negligible.)
    assert out.shape == (batch, action_dim), out.shape
    assert bool(jnp.all(jnp.isfinite(out))), out
    assert jnp.allclose(out, ref, atol=2e-2, rtol=2e-2), (out, ref)

    print("KERNEL_OK")
</pallas_src>

<mosaic_0001>
module attributes {stable_mosaic.version = 11 : i64} {
  func.func @_fcdp_kernel(%arg0: i32, %arg1: memref<8x16xbf16, #tpu.memory_space<vmem>>, %arg2: memref<16x128xbf16, #tpu.memory_space<vmem>>, %arg3: memref<1x128xf32, #tpu.memory_space<vmem>>, %arg4: memref<128x128xbf16, #tpu.memory_space<vmem>>, %arg5: memref<1x128xf32, #tpu.memory_space<vmem>>, %arg6: memref<128x128xbf16, #tpu.memory_space<vmem>>, %arg7: memref<1x2xf32, #tpu.memory_space<vmem>>, %arg8: memref<1x2xf32, #tpu.memory_space<vmem>>, %arg9: memref<1x2xf32, #tpu.memory_space<vmem>>, %arg10: memref<8x2xf32, #tpu.memory_space<vmem>>) attributes {dimension_semantics = [#tpu.dimension_semantics<parallel>], iteration_bounds = array<i64: 1>, scalar_prefetch = 0 : i64, scratch_operands = 0 : i64, tpu.core_type = #tpu.core_type<tc>, window_params = [{transform_indices = @transform_0, window_bounds = array<i64: 8, 16>}, {pipeline_mode = #tpu.pipeline_mode<synchronous>, transform_indices = @transform_1, window_bounds = array<i64: 16, 128>}, {pipeline_mode = #tpu.pipeline_mode<synchronous>, transform_indices = @transform_2, window_bounds = array<i64: 1, 128>}, {pipeline_mode = #tpu.pipeline_mode<synchronous>, transform_indices = @transform_3, window_bounds = array<i64: 128, 128>}, {pipeline_mode = #tpu.pipeline_mode<synchronous>, transform_indices = @transform_4, window_bounds = array<i64: 1, 128>}, {pipeline_mode = #tpu.pipeline_mode<synchronous>, transform_indices = @transform_5, window_bounds = array<i64: 128, 128>}, {pipeline_mode = #tpu.pipeline_mode<synchronous>, transform_indices = @transform_6, window_bounds = array<i64: 1, 2>}, {pipeline_mode = #tpu.pipeline_mode<synchronous>, transform_indices = @transform_7, window_bounds = array<i64: 1, 2>}, {pipeline_mode = #tpu.pipeline_mode<synchronous>, transform_indices = @transform_8, window_bounds = array<i64: 1, 2>}, {transform_indices = @transform_9, window_bounds = array<i64: 8, 2>}]} {
    %c0 = arith.constant 0 : index
    %c0_0 = arith.constant 0 : index
    %0 = vector.load %arg1[%c0, %c0_0] : memref<8x16xbf16, #tpu.memory_space<vmem>>, vector<8x16xbf16>
    %c0_1 = arith.constant 0 : index
    %c0_2 = arith.constant 0 : index
    %1 = vector.load %arg2[%c0_1, %c0_2] : memref<16x128xbf16, #tpu.memory_space<vmem>>, vector<16x128xbf16>
    %cst = arith.constant dense<0.000000e+00> : vector<8x128xf32>
    %2 = tpu.matmul %0, %1, %cst {dimension_numbers = #tpu.dot_dimension_numbers<[1], [0], [0], [1], [0, 0, 1, 1], [], []>} : vector<8x16xbf16>, vector<16x128xbf16>, vector<8x128xf32> -> vector<8x128xf32>
    %c0_3 = arith.constant 0 : index
    %c0_4 = arith.constant 0 : index
    %3 = vector.load %arg3[%c0_3, %c0_4] : memref<1x128xf32, #tpu.memory_space<vmem>>, vector<1x128xf32>
    %4 = vector.broadcast %3 : vector<1x128xf32> to vector<8x128xf32>
    %5 = arith.addf %2, %4 : vector<8x128xf32>
    %cst_5 = arith.constant 0.000000e+00 : f32
    %6 = vector.broadcast %cst_5 : f32 to vector<8x128xf32>
    %7 = arith.maximumf %5, %6 : vector<8x128xf32>
    %8 = arith.truncf %7 : vector<8x128xf32> to vector<8x128xbf16>
    %c0_6 = arith.constant 0 : index
    %c0_7 = arith.constant 0 : index
    %9 = vector.load %arg4[%c0_6, %c0_7] : memref<128x128xbf16, #tpu.memory_space<vmem>>, vector<128x128xbf16>
    %cst_8 = arith.constant dense<0.000000e+00> : vector<8x128xf32>
    %10 = tpu.matmul %8, %9, %cst_8 {dimension_numbers = #tpu.dot_dimension_numbers<[1], [0], [0], [1], [0, 0, 1, 1], [], []>} : vector<8x128xbf16>, vector<128x128xbf16>, vector<8x128xf32> -> vector<8x128xf32>
    %c0_9 = arith.constant 0 : index
    %c0_10 = arith.constant 0 : index
    %11 = vector.load %arg5[%c0_9, %c0_10] : memref<1x128xf32, #tpu.memory_space<vmem>>, vector<1x128xf32>
    %12 = vector.broadcast %11 : vector<1x128xf32> to vector<8x128xf32>
    %13 = arith.addf %10, %12 : vector<8x128xf32>
    %cst_11 = arith.constant 0.000000e+00 : f32
    %14 = vector.broadcast %cst_11 : f32 to vector<8x128xf32>
    %15 = arith.maximumf %13, %14 : vector<8x128xf32>
    %16 = arith.truncf %15 : vector<8x128xf32> to vector<8x128xbf16>
    %c0_12 = arith.constant 0 : index
    %c0_13 = arith.constant 0 : index
    %17 = vector.load %arg6[%c0_12, %c0_13] : memref<128x128xbf16, #tpu.memory_space<vmem>>, vector<128x128xbf16>
    %cst_14 = arith.constant dense<0.000000e+00> : vector<8x128xf32>
    %18 = tpu.matmul %16, %17, %cst_14 {dimension_numbers = #tpu.dot_dimension_numbers<[1], [0], [0], [1], [0, 0, 1, 1], [], []>} : vector<8x128xbf16>, vector<128x128xbf16>, vector<8x128xf32> -> vector<8x128xf32>
    %19 = vector.extract_strided_slice %18 {offsets = [0, 0], sizes = [8, 2], strides = [1, 1]} : vector<8x128xf32> to vector<8x2xf32>
    %c0_15 = arith.constant 0 : index
    %c0_16 = arith.constant 0 : index
    %20 = vector.load %arg7[%c0_15, %c0_16] : memref<1x2xf32, #tpu.memory_space<vmem>>, vector<1x2xf32>
    %21 = vector.broadcast %20 : vector<1x2xf32> to vector<8x2xf32>
    %22 = arith.addf %19, %21 : vector<8x2xf32>
    %23 = math.tanh %22 : vector<8x2xf32>
    %c0_17 = arith.constant 0 : index
    %c0_18 = arith.constant 0 : index
    %24 = vector.load %arg8[%c0_17, %c0_18] : memref<1x2xf32, #tpu.memory_space<vmem>>, vector<1x2xf32>
    %25 = vector.broadcast %24 : vector<1x2xf32> to vector<8x2xf32>
    %26 = arith.mulf %23, %25 : vector<8x2xf32>
    %c0_19 = arith.constant 0 : index
    %c0_20 = arith.constant 0 : index
    %27 = vector.load %arg9[%c0_19, %c0_20] : memref<1x2xf32, #tpu.memory_space<vmem>>, vector<1x2xf32>
    %28 = vector.broadcast %27 : vector<1x2xf32> to vector<8x2xf32>
    %29 = arith.addf %26, %28 : vector<8x2xf32>
    %c0_21 = arith.constant 0 : index
    %c0_22 = arith.constant 0 : index
    %30 = vector.load %arg10[%c0_21, %c0_22] : memref<8x2xf32, #tpu.memory_space<vmem>>, vector<8x2xf32>
    tpu.vector_store %arg10[%c0_21, %c0_22], %29 {strides = array<i32>} : memref<8x2xf32, #tpu.memory_space<vmem>>, vector<8x2xf32>,
    return
  }
  func.func @transform_0(%arg0: i32) -> (i32, i32) {
    %c0_i32 = arith.constant 0 : i32
    %c0_i32_0 = arith.constant 0 : i32
    return %arg0, %c0_i32 : i32, i32
  }
  func.func @transform_1(%arg0: i32) -> (i32, i32) {
    %c0_i32 = arith.constant 0 : i32
    %c0_i32_0 = arith.constant 0 : i32
    %c0_i32_1 = arith.constant 0 : i32
    return %c0_i32, %c0_i32_0 : i32, i32
  }
  func.func @transform_2(%arg0: i32) -> (i32, i32) {
    %c0_i32 = arith.constant 0 : i32
    %c0_i32_0 = arith.constant 0 : i32
    %c0_i32_1 = arith.constant 0 : i32
    return %c0_i32, %c0_i32_0 : i32, i32
  }
  func.func @transform_3(%arg0: i32) -> (i32, i32) {
    %c0_i32 = arith.constant 0 : i32
    %c0_i32_0 = arith.constant 0 : i32
    %c0_i32_1 = arith.constant 0 : i32
    return %c0_i32, %c0_i32_0 : i32, i32
  }
  func.func @transform_4(%arg0: i32) -> (i32, i32) {
    %c0_i32 = arith.constant 0 : i32
    %c0_i32_0 = arith.constant 0 : i32
    %c0_i32_1 = arith.constant 0 : i32
    return %c0_i32, %c0_i32_0 : i32, i32
  }
  func.func @transform_5(%arg0: i32) -> (i32, i32) {
    %c0_i32 = arith.constant 0 : i32
    %c0_i32_0 = arith.constant 0 : i32
    %c0_i32_1 = arith.constant 0 : i32
    return %c0_i32, %c0_i32_0 : i32, i32
  }
  func.func @transform_6(%arg0: i32) -> (i32, i32) {
    %c0_i32 = arith.constant 0 : i32
    %c0_i32_0 = arith.constant 0 : i32
    %c0_i32_1 = arith.constant 0 : i32
    return %c0_i32, %c0_i32_0 : i32, i32
  }
  func.func @transform_7(%arg0: i32) -> (i32, i32) {
    %c0_i32 = arith.constant 0 : i32
    %c0_i32_0 = arith.constant 0 : i32
    %c0_i32_1 = arith.constant 0 : i32
    return %c0_i32, %c0_i32_0 : i32, i32
  }
  func.func @transform_8(%arg0: i32) -> (i32, i32) {
    %c0_i32 = arith.constant 0 : i32
    %c0_i32_0 = arith.constant 0 : i32
    %c0_i32_1 = arith.constant 0 : i32
    return %c0_i32, %c0_i32_0 : i32, i32
  }
  func.func @transform_9(%arg0: i32) -> (i32, i32) {
    %c0_i32 = arith.constant 0 : i32
    %c0_i32_0 = arith.constant 0 : i32
    return %arg0, %c0_i32 : i32, i32
  }
}

</mosaic_0001>

<bundles_post_ra>
// kernel: tpu_custom_call.1
= control target key start
LH: loop header
LB: loop body
LE: loop exit
PB: predicated region body
PF: predicated region fallthrough
CT: control target
= control target key end

     0   :  { %14 = vsyncpa [#allocation3], 0  ;;  %s762_s0 = inlined_call_operand.hbm [shape: bf16[8,16], index: 0, kind: input, shape index: {}]   ;;  %s763_s1 = inlined_call_operand.hbm [shape: bf16[16,128], index: 1, kind: input, shape index: {}]   ;;  %s764_s2 = inlined_call_operand.vmem [shape: f32[1,128], index: 2, kind: input, shape index: {}]   ;;  %s765_s3 = inlined_call_operand.hbm [shape: bf16[128,128], index: 3, kind: input, shape index: {}]   ;;  %s766_s4 = inlined_call_operand.vmem [shape: f32[1,128], index: 4, kind: input, shape index: {}]   ;;  %s767_s5 = inlined_call_operand.hbm [shape: bf16[128,128], index: 5, kind: input, shape index: {}]   ;;  %s768_s6 = inlined_call_operand.vmem [shape: f32[1,2], index: 6, kind: input, shape index: {}]   ;;  %s769_s7 = inlined_call_operand.vmem [shape: f32[1,2], index: 7, kind: input, shape index: {}]   ;;  %s770_s8 = inlined_call_operand.vmem [shape: f32[1,2], index: 8, kind: input, shape index: {}]   ;;  %s771_s9 = inlined_call_operand.vmem [shape: f32[8,2], index: 9, kind: output, shape index: {}]  }
   0x1   :  { %15 = vsyncpa [#allocation5], 0 }
   0x2   :  { %16 = vsyncpa [#allocation8], 0  ;;  %s609_s30 = smov [#allocation4]   ;;  %s515_s13 = scalar_lea.hbm %s763_s1, 128 }
   0x3   :  { %s32_s10 = sshll.u32 %s609_s30, 4  ;;  %p516_p0 = scmp.ne.s32.totalorder %s763_s1, %s515_s13  ;;  %s33_s10 = int_to_ptr.vmem [resolvable:$true] %s32_s10 }
   0x4   :  { %p519_p1 = scmp.lt.u32.totalorder %s515_s13, %s763_s1 }
   0x6   :  { %p521_p2 = pnand %p519_p1, %p516_p0 }
   0x8   :  { %524 = shalt.err (!%p521_p2)
}
   0x9   :  { %s525_s18 = scalar_lea.vmem %s33_s10, 128  ;;  %p530_p4 = scmp.lt.s32.totalorder %s33_s10, %s33_s10 }
   0xa   :  { %p526_p3 = scmp.ne.s32.totalorder %s33_s10, %s525_s18  ;;  %p531_p5 = scmp.lt.s32.totalorder %s525_s18, %s525_s18 }
   0xc   :  { %p532_p6 = por %p531_p5, %p530_p4 }
   0xe   :  { %p533_p7 = pnand %p532_p6, %p526_p3 }
  0x10   :  { %536 = shalt.err (!%p533_p7)
}
  0x11   :  { %s610_s19 = smov 64   ;;  %s611_s20 = smov 4  }
  0x12   :  { %38 = dma.hbm_to_vmem [thread:$0]  %s763_s1, 128, %s33_s10, [#allocation5], %s610_s19, %s610_s19, %s611_s20  }
  0x13   :  { %s612_s23 = smov [#allocation2]   ;;  %s613_s25 = smov [#allocation6]  }
  0x14   :  { %s23_s24 = sshll.u32 %s612_s23, 4  ;;  %s46_s26 = sshll.u32 %s613_s25, 4  ;;  %s24_s24 = int_to_ptr.vmem [resolvable:$true] %s23_s24  ;;  %s47_s26 = int_to_ptr.vmem [resolvable:$true] %s46_s26 }
  0x15   :  { %s537_s29 = scalar_lea.hbm %s762_s0, 64 }
  0x16   :  { %p538_p8 = scmp.ne.s32.totalorder %s762_s0, %s537_s29  ;;  %p541_p9 = scmp.lt.u32.totalorder %s537_s29, %s762_s0 }
  0x18   :  { %p543_p10 = pnand %p541_p9, %p538_p8 }
  0x1a   :  { %546 = shalt.err (!%p543_p10)
}
  0x1b   :  { %s547_s1 = scalar_lea.vmem %s24_s24, 64  ;;  %p552_p12 = scmp.lt.s32.totalorder %s24_s24, %s24_s24 }
  0x1c   :  { %p548_p11 = scmp.ne.s32.totalorder %s24_s24, %s547_s1  ;;  %p553_p13 = scmp.lt.s32.totalorder %s547_s1, %s547_s1 }
  0x1e   :  { %p554_p0 = por %p553_p13, %p552_p12 }
  0x20   :  { %p555_p1 = pnand %p554_p0, %p548_p11 }
  0x22   :  { %558 = shalt.err (!%p555_p1)
}
  0x23   :  { %26 = dma.hbm_to_vmem [thread:$0]  %s762_s0, 64, %s24_s24, [#allocation3]  }
  0x24   :  { %s559_s17 = scalar_lea.hbm %s765_s3, 1024 }
  0x25   :  { %p560_p2 = scmp.ne.s32.totalorder %s765_s3, %s559_s17  ;;  %p563_p3 = scmp.lt.u32.totalorder %s559_s17, %s765_s3 }
  0x27   :  { %p565_p4 = pnand %p563_p3, %p560_p2 }
  0x29   :  { %568 = shalt.err (!%p565_p4)
}
  0x2a   :  { %s569_s25 = scalar_lea.vmem %s47_s26, 1024  ;;  %p574_p6 = scmp.lt.s32.totalorder %s47_s26, %s47_s26 }
  0x2b   :  { %p570_p5 = scmp.ne.s32.totalorder %s47_s26, %s569_s25  ;;  %p575_p7 = scmp.lt.s32.totalorder %s569_s25, %s569_s25 }
  0x2d   :  { %p576_p8 = por %p575_p7, %p574_p6 }
  0x2f   :  { %p577_p9 = pnand %p576_p8, %p570_p5 }
  0x31   :  { %580 = shalt.err (!%p577_p9)
}
  0x32   :  { %52 = dma.hbm_to_vmem [thread:$0]  %s765_s3, 1024, %s47_s26, [#allocation5], %s610_s19, %s610_s19, %s611_s20  }
  0x33   :  { %s614_s27 = smov [#allocation7]   ;;  %s581_s11 = scalar_lea.hbm %s767_s5, 1024 }
  0x34   :  { %s60_s28 = sshll.u32 %s614_s27, 4  ;;  %p582_p10 = scmp.ne.s32.totalorder %s767_s5, %s581_s11  ;;  %s61_s28 = int_to_ptr.vmem [resolvable:$true] %s60_s28 }
  0x35   :  { %p585_p11 = scmp.lt.u32.totalorder %s581_s11, %s767_s5 }
  0x37   :  { %p587_p12 = pnand %p585_p11, %p582_p10 }
  0x39   :  { %590 = shalt.err (!%p587_p12)
}
  0x3a   :  { %s591_s14 = scalar_lea.vmem %s61_s28, 1024  ;;  %p596_p0 = scmp.lt.s32.totalorder %s61_s28, %s61_s28 }
  0x3b   :  { %p592_p13 = scmp.ne.s32.totalorder %s61_s28, %s591_s14  ;;  %p597_p1 = scmp.lt.s32.totalorder %s591_s14, %s591_s14 }
  0x3d   :  { %p598_p2 = por %p597_p1, %p596_p0 }
  0x3f   :  { %p599_p3 = pnand %p598_p2, %p592_p13 }
  0x41   :  { %602 = shalt.err (!%p599_p3)
}
  0x42   :  { %66 = dma.hbm_to_vmem [thread:$0]  %s767_s5, 1024, %s61_s28, [#allocation8], %s610_s19, %s610_s19, %s611_s20  }
  0x43   :  { %603 = dma.done.wait [#allocation3], 64  }
  0x44   :  { %604 = vsyncadd [#allocation3], 4294967232 }
  0x45   :  { %605 = dma.done.wait [#allocation5], 1152  }
  0x46   :  { %606 = vsyncadd [#allocation5], 4294966144 }
  0x47   :  { %607 = dma.done.wait [#allocation8], 1024  }
  0x48   :  { %608 = vsyncadd [#allocation8], 4294966272  ;;  %v615_v0 = vmov 0.0   ;;  %vm616_vm0 = vmmov 0   ;;  %v496_v1 = vld [vmem:[#allocation4] sm:$0xff]   ;;  %vm102_vm1 = vcmask 130048  }
  0x49   :  { %442 = vmatprep.subr.bf16.mxu0 %v615_v0  ;;  %444 = vmatprep.mubr.msk.bf16.mxu0 %vm616_vm0, %v615_v0  ;;  %v86_v2 = vld [vmem:[#allocation2] sm:$0xf]  ;;  %v497_v3 = vld [vmem:[#allocation6] sm:$0xff]   ;;  %v498_v4 = vld [vmem:[#allocation6 + $0x8] sm:$0xff]   ;;  %vm390_vm2 = vcmask 15360  }
  0x4a   :  { %448 = vmatprep.subr.bf16.mxu1 %v615_v0  ;;  %464 = vmatprep.mubr.msk.bf16.mxu1 %vm616_vm0, %v615_v0  ;;  %v499_v5 = vld [vmem:[#allocation6 + $0x10] sm:$0xff]   ;;  %v500_v6 = vld [vmem:[#allocation6 + $0x18] sm:$0xff]   ;;  %v501_v7 = vld [vmem:[#allocation6 + $0x20] sm:$0xff]  }
  0x4b   :  { %443 = vmatpush3.bf16.msra.mxu0 %v496_v1  ;;  %449 = vmatpush3.bf16.msra.mxu1 %v497_v3  ;;  %v502_v8 = vld [vmem:[#allocation6 + $0x28] sm:$0xff]   ;;  %v503_v9 = vld [vmem:[#allocation6 + $0x30] sm:$0xff]   ;;  %v504_v10 = vld [vmem:[#allocation6 + $0x38] sm:$0xff]  }
  0x4c   :  { %468 = vmatprep.subr.bf16.mxu0 %v615_v0  ;;  %450 = vmatprep.subr.bf16.mxu1 %v615_v0  ;;  %v505_v11 = vld [vmem:[#allocation7] sm:$0xff]   ;;  %v506_v12 = vld [vmem:[#allocation7 + $0x8] sm:$0xff]   ;;  %v507_v13 = vld [vmem:[#allocation7 + $0x10] sm:$0xff]  }
  0x4d   :  { %v508_v14 = vld [vmem:[#allocation7 + $0x18] sm:$0xff]   ;;  %v509_v15 = vld [vmem:[#allocation7 + $0x20] sm:$0xff]   ;;  %v510_v16 = vld [vmem:[#allocation7 + $0x28] sm:$0xff]  }
  0x4e   :  { %445 = vmatmul.mubr.msk.bf16.vlgmr.msra.gmra.mrb[0].mxu0 %vm102_vm1, %v86_v2  ;;  %v399_v17 = vld [vmem:[%s764_s2] ss:$0 sm:$0xff]  ;;  %v511_v25 = vld [vmem:[#allocation7 + $0x30] sm:$0xff]   ;;  %v512_v26 = vld [vmem:[#allocation7 + $0x38] sm:$0xff]  }
  0x4f   :  { %484 = vmatprep.mubr.msk.bf16.mxu0 %vm616_vm0, %v615_v0  ;;  %451 = vmatpush3.bf16.msra.mxu1 %v498_v4  ;;  %v402_v27 = vld [vmem:[%s766_s4] ss:$0 sm:$0xff] }
  0x50   :  { %452 = vmatprep.subr.bf16.mxu1 %v615_v0  ;;  %469 = vmatpush3.bf16.msra.mxu0 %v505_v11  ;;  %v419_v35 = vld [vmem:[%s768_s6] ss:$0 sm:$0xff] }
  0x51   :  { %470 = vmatprep.subr.bf16.mxu0 %v615_v0  ;;  %v420_v41 = vld [vmem:[%s769_s7] ss:$0 sm:$0xff] }
  0x52   :  { %v421_v43 = vld [vmem:[%s770_s8] ss:$0 sm:$0xff] }
  0x53   :  { %453 = vmatpush3.bf16.msra.mxu1 %v499_v5 }
  0x54   :  { %454 = vmatprep.subr.bf16.mxu1 %v615_v0  ;;  %471 = vmatpush3.bf16.msra.mxu0 %v506_v12 }
  0x55   :  { %472 = vmatprep.subr.bf16.mxu0 %v615_v0 }
  0x57   :  { %455 = vmatpush3.bf16.msra.mxu1 %v500_v6 }
  0x58   :  { %456 = vmatprep.subr.bf16.mxu1 %v615_v0  ;;  %473 = vmatpush3.bf16.msra.mxu0 %v507_v13 }
  0x59   :  { %474 = vmatprep.subr.bf16.mxu0 %v615_v0 }
  0x5b   :  { %457 = vmatpush3.bf16.msra.mxu1 %v501_v7 }
  0x5c   :  { %458 = vmatprep.subr.bf16.mxu1 %v615_v0  ;;  %475 = vmatpush3.bf16.msra.mxu0 %v508_v14 }
  0x5d   :  { %476 = vmatprep.subr.bf16.mxu0 %v615_v0 }
  0x5f   :  { %459 = vmatpush3.bf16.msra.mxu1 %v502_v8 }
  0x60   :  { %460 = vmatprep.subr.bf16.mxu1 %v615_v0  ;;  %477 = vmatpush3.bf16.msra.mxu0 %v509_v15 }
  0x61   :  { %478 = vmatprep.subr.bf16.mxu0 %v615_v0 }
  0x63   :  { %461 = vmatpush3.bf16.msra.mxu1 %v503_v9 }
  0x64   :  { %462 = vmatprep.subr.bf16.mxu1 %v615_v0  ;;  %479 = vmatpush3.bf16.msra.mxu0 %v510_v16 }
  0x65   :  { %480 = vmatprep.subr.bf16.mxu0 %v615_v0 }
  0x67   :  { %463 = vmatpush3.bf16.msra.mxu1 %v504_v10 }
  0x68   :  { %481 = vmatpush3.bf16.msra.mxu0 %v511_v25 }
  0x69   :  { %482 = vmatprep.subr.bf16.mxu0 %v615_v0 }
  0x6c   :  { %483 = vmatpush3.bf16.msra.mxu0 %v512_v26 }
 0x121   :  { %v140_v18 = vpop.f32.mrb[0].mxu0 }
 0x122   :  { %v141_v19 = vadd.f32 %v399_v17, %v140_v18  ;;  %v446_v20 = vpop.f32.mrb[1].mxu0 }
 0x123   :  { %v143_v21 = vpop.f32.mrb[2].mxu0 }
 0x124   :  { %v146_v22 = vmax.f32 %v141_v19, 0.0  ;;  %v447_v23 = vpop.f32.mrb[3].mxu0 }
 0x126   :  { %v147_v24 = vpack.c.bf16 %v146_v22, %v146_v22 }
 0x128   :  { %465 = vmatmul.mubr.bf16.vlgmr.msra.gmra.mrb[0].mxu1 %v147_v24 }
 0x1fb   :  { %v253_v28 = vpop.f32.mrb[0].mxu1 }
 0x1fc   :  { %v254_v29 = vadd.f32 %v402_v27, %v253_v28  ;;  %v466_v30 = vpop.f32.mrb[1].mxu1 }
 0x1fd   :  { %v256_v31 = vpop.f32.mrb[2].mxu1 }
 0x1fe   :  { %v259_v32 = vmax.f32 %v254_v29, 0.0  ;;  %v467_v33 = vpop.f32.mrb[3].mxu1 }
 0x200   :  { %v260_v34 = vpack.c.bf16 %v259_v32, %v259_v32 }
 0x202   :  { %485 = vmatmul.mubr.bf16.vlgmr.msra.gmra.mrb[4].mxu0 %v260_v34 }
 0x2d5   :  { %v359_v36 = vpop.f32.mrb[4].mxu0 }
 0x2d6   :  { %v372_v37 = vadd.f32 %v419_v35, %v359_v36  ;;  %v486_v38 = vpop.f32.mrb[5].mxu0 }
 0x2d7   :  { %v362_v39 = vpop.f32.mrb[6].mxu0 }
 0x2d8   :  { %513 = vtanh.f32 %v372_v37  ;;  %v487_v40 = vpop.f32.mrb[7].mxu0 }
 0x2e2   :  { %v514_v42 = vpop.eup %513 }
 0x2e3   :  { %v381_v44 = vmul.f32 %v514_v42, %v420_v41 }
 0x2e5   :  { %v389_v45 = vadd.f32 %v421_v43, %v381_v44 }
 0x2e7   :  { %391 = vst.msk [vmem:[%s771_s9] sm:$0xff] %vm390_vm2, %v389_v45 }
 0x2e8   :  { %396 = vsyncpa [#allocation3], 1 }
 0x2e9   :  { %397 = vsyncpa [#allocation5], 1 }
 0x2ea   :  { %398 = vsyncpa [#allocation8], 1 }

</bundles_post_ra>
